<compile_context>
chip_gen: v7x
topology: tpu7x:2x2x1
jax: 0.10.0
libtpu: 0.0.40
codegen_flags: <defaults>
</compile_context>

<pallas_src>
import jax
import jax.numpy as jnp
from jax.experimental import pallas as pl
from jax.experimental.pallas import tpu as pltpu


def vae_encoder_kernel(x_ref, w1_ref, b1_ref, w23_ref, b23_ref, eps_ref,
                       z_ref, kl_ref):
    x = x_ref[...].astype(jnp.float32)

    # linear1 + relu
    h = jnp.dot(x, w1_ref[...], preferred_element_type=jnp.float32) + b1_ref[...]
    h = jnp.maximum(h, 0.0)

    # fused linear2 | linear3: a single (L, 2L) matmul, slice mu / log_sigma.
    ml = jnp.dot(h, w23_ref[...], preferred_element_type=jnp.float32) + b23_ref[...]
    L = ml.shape[1] // 2
    mu = ml[:, :L]
    log_sigma = ml[:, L:]
    sigma = jnp.exp(log_sigma)

    # reparameterization: z = mu + sigma * eps,  eps ~ N(0, 1)
    # TODO(synk): eps could be generated in-kernel with pltpu.prng_* to drop
    # this input; kept as an explicit input for deterministic verification.
    z_ref[...] = (mu + sigma * eps_ref[...]).astype(z_ref.dtype)

    # KL term: sum(sigma^2 + mu^2 - 2*log_sigma - 1).  The "-1" over B*L
    # elements is a compile-time constant, subtracted from the scalar.
    n_elems = float(mu.shape[0] * mu.shape[1])
    kl_ref[0, 0] = jnp.sum(sigma * sigma + mu * mu - 2.0 * log_sigma) - n_elems


def variational_encoder(features, params, eps):
    """features: (B, D_in) f32; returns (z: (B, L) f32, kl: scalar f32)."""
    B, D = features.shape
    L = params["w1"].shape[1]

    # Pack linear2/linear3 into one wide weight / bias for a single matmul.
    w23 = jnp.concatenate([params["w2"], params["w3"]], axis=1)   # (L, 2L)
    b23 = jnp.concatenate([params["b2"], params["b3"]], axis=1)   # (1, 2L)

    vmem = pl.BlockSpec(memory_space=pltpu.MemorySpace.VMEM)
    smem = pl.BlockSpec(memory_space=pltpu.MemorySpace.SMEM)

    z, kl = pl.pallas_call(
        vae_encoder_kernel,
        out_shape=(
            jax.ShapeDtypeStruct((B, L), features.dtype),   # z
            jax.ShapeDtypeStruct((1, 1), jnp.float32),      # kl (scalar)
        ),
        in_specs=[vmem, vmem, vmem, vmem, vmem, vmem],
        out_specs=(vmem, smem),
    )(features, params["w1"], params["b1"], w23, b23, eps)

    return z, kl[0, 0]


def init_params(key, input_shape, latent_dim):
    """Deterministic synthetic parameters (PyTorch Linear init, pre-transposed)."""
    k1, k2, k3, k4, k5, k6 = jax.random.split(key, 6)

    def lin(kw, kb, fan_in, fan_out):
        bound = 1.0 / jnp.sqrt(fan_in)
        w = jax.random.uniform(kw, (fan_in, fan_out), jnp.float32, -bound, bound)
        b = jax.random.uniform(kb, (1, fan_out), jnp.float32, -bound, bound)
        return w, b

    w1, b1 = lin(k1, k2, input_shape, latent_dim)
    w2, b2 = lin(k3, k4, latent_dim, latent_dim)
    w3, b3 = lin(k5, k6, latent_dim, latent_dim)
    return {"w1": w1, "b1": b1, "w2": w2, "b2": b2, "w3": w3, "b3": b3}


if __name__ == "__main__":
    # Small shapes consistent with the module: VariationalEncoder(input_shape=16, latent_dim=8)
    batch, input_shape, latent_dim = 8, 16, 8

    key = jax.random.PRNGKey(0)
    k_params, k_x, k_eps = jax.random.split(key, 3)

    params = init_params(k_params, input_shape, latent_dim)
    x = jax.random.normal(k_x, (batch, input_shape), jnp.float32)
    # Standard-normal noise for the reparameterization trick (self.N.sample(mu.shape)).
    eps = jax.random.normal(k_eps, (batch, latent_dim), jnp.float32)

    z, kl = variational_encoder(x, params, eps)
    jax.block_until_ready((z, kl))

    # Pure-JAX reference check (unfused linear2/linear3).
    h_ref = jnp.maximum(x @ params["w1"] + params["b1"], 0.0)
    mu_ref = h_ref @ params["w2"] + params["b2"]
    ls_ref = h_ref @ params["w3"] + params["b3"]
    sig_ref = jnp.exp(ls_ref)
    z_ref = mu_ref + sig_ref * eps
    kl_ref = jnp.sum(sig_ref**2 + mu_ref**2 - 2.0 * ls_ref - 1.0)

    assert jnp.allclose(z, z_ref, atol=1e-5, rtol=1e-5)
    assert jnp.allclose(kl, kl_ref, atol=1e-4, rtol=1e-5)

    print("KERNEL_OK")
</pallas_src>

<mosaic_0001>
module attributes {stable_mosaic.version = 11 : i64} {
  func.func @vae_encoder_kernel(%arg0: memref<8x16xf32, #tpu.memory_space<vmem>>, %arg1: memref<16x8xf32, #tpu.memory_space<vmem>>, %arg2: memref<1x8xf32, #tpu.memory_space<vmem>>, %arg3: memref<8x16xf32, #tpu.memory_space<vmem>>, %arg4: memref<1x16xf32, #tpu.memory_space<vmem>>, %arg5: memref<8x8xf32, #tpu.memory_space<vmem>>, %arg6: memref<8x8xf32, #tpu.memory_space<vmem>>, %arg7: memref<1x1xf32, #tpu.memory_space<smem>>) attributes {dimension_semantics = [], scalar_prefetch = 0 : i64, scratch_operands = 0 : i64, tpu.core_type = #tpu.core_type<tc>} {
    %c0 = arith.constant 0 : index
    %c0_0 = arith.constant 0 : index
    %0 = vector.load %arg0[%c0, %c0_0] : memref<8x16xf32, #tpu.memory_space<vmem>>, vector<8x16xf32>
    %c0_1 = arith.constant 0 : index
    %c0_2 = arith.constant 0 : index
    %1 = vector.load %arg1[%c0_1, %c0_2] : memref<16x8xf32, #tpu.memory_space<vmem>>, vector<16x8xf32>
    %cst = arith.constant dense<0.000000e+00> : vector<8x8xf32>
    %2 = tpu.matmul %0, %1, %cst {dimension_numbers = #tpu.dot_dimension_numbers<[1], [0], [0], [1], [0, 0, 1, 1], [], []>} : vector<8x16xf32>, vector<16x8xf32>, vector<8x8xf32> -> vector<8x8xf32>
    %c0_3 = arith.constant 0 : index
    %c0_4 = arith.constant 0 : index
    %3 = vector.load %arg2[%c0_3, %c0_4] : memref<1x8xf32, #tpu.memory_space<vmem>>, vector<1x8xf32>
    %4 = vector.broadcast %3 : vector<1x8xf32> to vector<8x8xf32>
    %5 = arith.addf %2, %4 : vector<8x8xf32>
    %cst_5 = arith.constant 0.000000e+00 : f32
    %6 = vector.broadcast %cst_5 : f32 to vector<8x8xf32>
    %7 = arith.maximumf %5, %6 : vector<8x8xf32>
    %c0_6 = arith.constant 0 : index
    %c0_7 = arith.constant 0 : index
    %8 = vector.load %arg3[%c0_6, %c0_7] : memref<8x16xf32, #tpu.memory_space<vmem>>, vector<8x16xf32>
    %cst_8 = arith.constant dense<0.000000e+00> : vector<8x16xf32>
    %9 = tpu.matmul %7, %8, %cst_8 {dimension_numbers = #tpu.dot_dimension_numbers<[1], [0], [0], [1], [0, 0, 1, 1], [], []>} : vector<8x8xf32>, vector<8x16xf32>, vector<8x16xf32> -> vector<8x16xf32>
    %c0_9 = arith.constant 0 : index
    %c0_10 = arith.constant 0 : index
    %10 = vector.load %arg4[%c0_9, %c0_10] : memref<1x16xf32, #tpu.memory_space<vmem>>, vector<1x16xf32>
    %11 = vector.broadcast %10 : vector<1x16xf32> to vector<8x16xf32>
    %12 = arith.addf %9, %11 : vector<8x16xf32>
    %13 = vector.extract_strided_slice %12 {offsets = [0, 0], sizes = [8, 8], strides = [1, 1]} : vector<8x16xf32> to vector<8x8xf32>
    %14 = vector.extract_strided_slice %12 {offsets = [0, 8], sizes = [8, 8], strides = [1, 1]} : vector<8x16xf32> to vector<8x8xf32>
    %15 = math.exp %14 : vector<8x8xf32>
    %c0_11 = arith.constant 0 : index
    %c0_12 = arith.constant 0 : index
    %16 = vector.load %arg5[%c0_11, %c0_12] : memref<8x8xf32, #tpu.memory_space<vmem>>, vector<8x8xf32>
    %17 = arith.mulf %15, %16 : vector<8x8xf32>
    %18 = arith.addf %13, %17 : vector<8x8xf32>
    %c0_13 = arith.constant 0 : index
    %c0_14 = arith.constant 0 : index
    %19 = vector.load %arg6[%c0_13, %c0_14] : memref<8x8xf32, #tpu.memory_space<vmem>>, vector<8x8xf32>
    tpu.vector_store %arg6[%c0_13, %c0_14], %18 {strides = array<i32>} : memref<8x8xf32, #tpu.memory_space<vmem>>, vector<8x8xf32>,
    %20 = arith.mulf %15, %15 : vector<8x8xf32>
    %21 = arith.mulf %13, %13 : vector<8x8xf32>
    %22 = arith.addf %20, %21 : vector<8x8xf32>
    %cst_15 = arith.constant 2.000000e+00 : f32
    %23 = vector.broadcast %cst_15 : f32 to vector<8x8xf32>
    %24 = arith.mulf %23, %14 : vector<8x8xf32>
    %25 = arith.subf %22, %24 : vector<8x8xf32>
    %26 = vector.shape_cast %25 : vector<8x8xf32> to vector<1x8x8xf32>
    %cst_16 = arith.constant dense<0.000000e+00> : vector<1xf32>
    %27 = vector.multi_reduction <add>, %26, %cst_16 [1, 2] : vector<1x8x8xf32> to vector<1xf32>
    %28 = vector.shape_cast %27 : vector<1xf32> to vector<1x1x1xf32>
    %29 = vector.extract %28[0, 0, 0] : f32 from vector<1x1x1xf32>
    %cst_17 = arith.constant 6.400000e+01 : f32
    %30 = arith.subf %29, %cst_17 : f32
    %c0_18 = arith.constant 0 : index
    %c0_19 = arith.constant 0 : index
    %31 = memref.load %arg7[%c0_18, %c0_19] : memref<1x1xf32, #tpu.memory_space<smem>>
    memref.store %30, %arg7[%c0_18, %c0_19] : memref<1x1xf32, #tpu.memory_space<smem>>
    return
  }
}

</mosaic_0001>

<bundles_post_ra>
// kernel: tpu_custom_call.1
= control target key start
LH: loop header
LB: loop body
LE: loop exit
PB: predicated region body
PF: predicated region fallthrough
CT: control target
= control target key end

     0   :  { %13 = vsyncpa [#allocation3], 0  ;;  %v333_v2 = vmov 0.0|0.0   ;;  %vm334_vm0 = vmmov 0   ;;  %v335_v4 = vmov 0.0   ;;  %s428_s0 = inlined_call_operand.vmem [shape: f32[8,16], index: 0, kind: input, shape index: {}]   ;;  %s429_s1 = inlined_call_operand.vmem [shape: f32[16,8], index: 1, kind: input, shape index: {}]   ;;  %s430_s2 = inlined_call_operand.vmem [shape: f32[1,8], index: 2, kind: input, shape index: {}]   ;;  %s431_s3 = inlined_call_operand.vmem [shape: f32[8,16], index: 3, kind: input, shape index: {}]   ;;  %s432_s4 = inlined_call_operand.vmem [shape: f32[1,16], index: 4, kind: input, shape index: {}]   ;;  %s433_s5 = inlined_call_operand.vmem [shape: f32[8,8], index: 5, kind: input, shape index: {}]   ;;  %s434_s6 = inlined_call_operand.hbm [shape: f32[8,8], index: 6, kind: output, shape index: {0}]   ;;  %s435_s7 = inlined_call_operand.hbm [shape: f32[1,1], index: 7, kind: output, shape index: {1}]  }
   0x1   :  { %v28_v0 = vld [vmem:[%s429_s1] sm:$0xff]  ;;  %v29_v1 = vld [vmem:[%s429_s1 + $0x8] sm:$0xff]  ;;  %283 = vmatprep.subr.bf16.mxu0 %v333_v2  ;;  %275 = vmatprep.mubr.msk.f32.mxu0 %vm334_vm0, %v335_v4 }
   0x2   :  { %v284_v3 = vpack.c.bf16 %v29_v1, %v28_v0 }
   0x3   :  { %14 = vsyncpa [#allocation4], 0  ;;  %278 = vmatprep.subr.mxu1 %v335_v4  ;;  %280 = vmatprep.mubr.msk.f32.mxu1 %vm334_vm0, %v335_v4  ;;  %v27_v5 = vld [vmem:[%s428_s0] sm:$0xff]  ;;  %vm37_vm1 = vcmask 130048   ;;  %vm120_vm2 = vcmask 64512   ;;  %s297_s16 = scalar_lea.hbm %s435_s7, 16 }
   0x4   :  { %285 = vmatpush3.bf16.msra.mxu0 %v284_v3  ;;  %v112_v6 = vld [vmem:[%s431_s3] sm:$0xff]  ;;  %s336_s3 = smov 8   ;;  %p298_p0 = scmp.ne.s32.totalorder %s435_s7, %s297_s16 }
   0x5   :  { %279 = vmatpush3.msra.mxu1 %v112_v6  ;;  %v261_v7 = vld [vmem:[%s430_s2] ss:$0 sm:$0xff]  ;;  %s337_s2 = smov 120   ;;  %p301_p1 = scmp.lt.u32.totalorder %s297_s16, %s435_s7 }
   0x6   :  { %v263_v12 = vld [vmem:[%s432_s4] ss:$0 sm:$0xff] }
   0x7   :  { %276 = vmatmul.mubr.msk.f32.vlgmr.msra.gmra.mrb[0].mxu0 %vm37_vm1, %v27_v5  ;;  %v196_v26 = vld [vmem:[%s433_s5] sm:$0xff]  ;;  %p303_p2 = pnand %p301_p1, %p298_p0 }
  0xda   :  { %v107_v8 = vpop.f32.mrb[0].mxu0 }
  0xdb   :  { %v108_v9 = vadd.f32 %v261_v7, %v107_v8  ;;  %v277_v10 = vpop.f32.mrb[1].mxu0 }
  0xdd   :  { %v111_v11 = vmax.f32 %v108_v9, 0.0 }
  0xdf   :  { %281 = vmatmul.mubr.msk.f32.vlgmr.msra.gmra.mrb[0].mxu1 %vm120_vm2, %v111_v11 }
 0x1b2   :  { %v190_v13 = vpop.f32.mrb[0].mxu1 }
 0x1b3   :  { %v191_v14 = vadd.f32 %v263_v12, %v190_v13  ;;  %v282_v15 = vpop.f32.mrb[1].mxu1 }
 0x1b5   :  { %v209_v16 = vmul.f32 %v191_v14, %v191_v14  ;;  %v194_v17 = vmul.f32 1.442695, %v191_v14  ;;  %v215_v21 = vmul.f32 2.0, %v191_v14 }
 0x1b7   :  { %211 = vrot.lane.b32.xlu0 %v209_v16, %s336_s3  ;;  %295 = vpow2.f32 %v194_v17 }
 0x1c1   :  { %v296_v18 = vpop.eup %295 }
 0x1c2   :  { %v208_v19 = vmul.f32 %v296_v18, %v296_v18 }
 0x229   :  { %v212_v20 = vpop.permute.xlu0 %211 }
 0x22a   :  { %v214_v22 = vadd.f32 %v212_v20, %v208_v19 }
 0x22c   :  { %v216_v23 = vsub.f32 %v214_v22, %v215_v21 }
 0x22e   :  { %218 = vrot.lane.b32.xlu0 %v216_v23, %s337_s2 }
 0x2a0   :  { %v219_v24 = vpop.permute.xlu0 %218 }
 0x2a1   :  { %v221_v25 = vsel %vm120_vm2, %v219_v24, 0.0 }
 0x2a2   :  { %222 = vadd.xlane.f32.xlu1 %v221_v25 }
 0x2b3   :  { %198 = vrot.lane.b32.xlu1 %v196_v26, %s336_s3 }
 0x32f   :  { %v223_v27 = vpop.xlane.xlu1 %222 }
 0x330   :  { %v224_v28 = vrot.slane %v223_v27, 4 }
 0x332   :  { %v225_v29 = vadd.f32 %v224_v28, %v223_v27 }
 0x333   :  { %v199_v30 = vpop.permute.xlu1 %198 }
 0x334   :  { %v226_v31 = vrot.slane %v225_v29, 2  ;;  %v201_v32 = vmul.f32 %v296_v18, %v199_v30 }
 0x336   :  { %203 = vrot.lane.b32.xlu0 %v201_v32, %s337_s2  ;;  %v227_v33 = vadd.f32 %v226_v31, %v225_v29 }
 0x338   :  { %v228_v34 = vrot.slane %v227_v33, 1 }
 0x33a   :  { %v229_v35 = vadd.f32 %v228_v34, %v227_v33 }
 0x33c   :  { %286 = vpush %v229_v35 }
 0x36d   :  { %s287_s12 = spop %286 }
 0x36e   :  { %s265_s13 = sadd.f32 -64.0, %s287_s12 }
 0x370   :  { %233 = sst [smem:[#allocation5]] %s265_s13 }
 0x371   :  { %306 = shalt.err (!%p303_p2)
}
 0x372   :  { %s338_s20 = smov [#allocation5]   ;;  %s339_s23 = smov [#allocation2]  }
 0x373   :  { %251 = dma.smem_to_hbm %s338_s20, 16, %s435_s7, [#allocation4]  }
 0x374   :  { %s240_s24 = sshll.u32 %s339_s23, 4  ;;  %s241_s24 = int_to_ptr.vmem [resolvable:$true] %s240_s24 }
 0x375   :  { %s307_s25 = scalar_lea.vmem %s241_s24, 128  ;;  %p312_p4 = scmp.lt.s32.totalorder %s241_s24, %s241_s24 }
 0x376   :  { %p308_p3 = scmp.ne.s32.totalorder %s241_s24, %s307_s25  ;;  %p313_p5 = scmp.lt.s32.totalorder %s307_s25, %s307_s25 }
 0x378   :  { %p314_p6 = por %p313_p5, %p312_p4 }
 0x37a   :  { %p315_p7 = pnand %p314_p6, %p308_p3 }
 0x3a8   :  { %v204_v36 = vpop.permute.xlu0 %203 }
 0x3a9   :  { %v206_v37 = vadd.f32 %v204_v36, %v191_v14 }
 0x3ab   :  { %207 = vst.msk [vmem:[#allocation2] sm:$0xff] %vm120_vm2, %v206_v37 }
 0x3ac   :  { %318 = shalt.err (!%p315_p7)
}
 0x3ad   :  { %s319_s28 = scalar_lea.hbm %s434_s6, 128 }
 0x3ae   :  { %p320_p8 = scmp.ne.s32.totalorder %s434_s6, %s319_s28  ;;  %p323_p9 = scmp.lt.u32.totalorder %s319_s28, %s434_s6 }
 0x3b0   :  { %p325_p10 = pnand %p323_p9, %p320_p8 }
 0x3b2   :  { %328 = shalt.err (!%p325_p10)
}
 0x3b3   :  { %243 = dma.vmem_to_hbm [thread:$0]  %s241_s24, 128, %s434_s6, [#allocation3]  }
 0x3b4   :  { %329 = dma.done.wait [#allocation3], 128  }
 0x3b5   :  { %330 = vsyncadd [#allocation3], 4294967168 }
 0x3b6   :  { %331 = dma.done.wait [#allocation4], 16  }
 0x3b7   :  { %332 = vsyncadd [#allocation4], 4294967280 }
 0x3b8   :  { %258 = sfence }
 0x3b9   :  { %259 = vsyncpa [#allocation3], 1 }
 0x3ba   :  { %260 = vsyncpa [#allocation4], 1 }

</bundles_post_ra>
